<compile_context>
chip_gen: v6e
topology: v6e:2x2x1
jax: 0.10.0
libtpu: 0.0.40
codegen_flags: <defaults>
</compile_context>

<pallas_src>
import math
import functools

import jax
import jax.numpy as jnp
from jax import lax
from jax.experimental import pallas as pl
from jax.experimental.pallas import tpu as pltpu


_TARGET_X_TILE_BYTES = 6 << 20   # ~6 MiB of x per grid step
_VMEM_CAP_BYTES = 48 << 20       # headroom-safe on v7x's 64 MiB physical VMEM


# --------------------------------------------------------------------------------------
# Buffer construction (identical to the PyTorch __init__)
# --------------------------------------------------------------------------------------
def _make_pe(d_model: int, max_len: int) -> jnp.ndarray:
    position = jnp.arange(max_len, dtype=jnp.float32)[:, None]            # [max_len, 1]
    div_term = jnp.exp(
        jnp.arange(0, d_model, 2, dtype=jnp.float32)
        * (-math.log(10000.0) / d_model)
    )                                                                      # [d_model/2]
    pe = jnp.zeros((max_len, 1, d_model), dtype=jnp.float32)
    pe = pe.at[:, 0, 0::2].set(jnp.sin(position * div_term))
    pe = pe.at[:, 0, 1::2].set(jnp.cos(position * div_term))
    return pe


# --------------------------------------------------------------------------------------
# Kernel helpers
# --------------------------------------------------------------------------------------
def _add_pe(x, pe, repeats: int):
    """x: (bs, B*D) or (bs, B, D); pe: (bs, W) or (bs, 1, D)."""
    if x.ndim == 3:
        return x + pe                       # implicit sublane broadcast over batch axis
    if repeats == 1:
        return x + pe
    # Lane-axis replication of the compact pe row; whole-vreg copies when the pe
    # width is a multiple of 128 (guaranteed when D % 128 == 0 or pe was pre-tiled).
    return x + jnp.concatenate([pe] * repeats, axis=-1)


def _keep_mask(shape, row_offset, seed, threshold):
    """Counter-based PRNG keep mask: deterministic per (seed, global element index).

    Uses only plain int32 VPU ops (iota / mul / xor / shift / and / cmp), so it lowers
    on Mosaic TPU and in interpret mode alike; no pltpu.prng_* primitives needed.
    """
    idx = lax.broadcasted_iota(jnp.int32, shape, 0) + row_offset
    for ax in range(1, len(shape)):
        idx = idx * shape[ax] + lax.broadcasted_iota(jnp.int32, shape, ax)
    # Weyl step + lowbias32-style finalizer (int32 arithmetic wraps; logical shifts
    # emulated with mask-after-arithmetic-shift).
    h = idx * jnp.int32(-1640531527) + seed                 # 0x9E3779B9
    h = h ^ ((h >> 16) & jnp.int32(0xFFFF))
    h = h * jnp.int32(569944749)                            # 0x21F0AAAD
    h = h ^ ((h >> 15) & jnp.int32(0x1FFFF))
    h = h * jnp.int32(1935093143)                           # 0x735A2D97
    h = h ^ ((h >> 15) & jnp.int32(0x1FFFF))
    u = h & jnp.int32(0x7FFFFFFF)                           # uniform in [0, 2^31)
    return u >= threshold


def _posenc_kernel_eval(x_ref, pe_ref, o_ref, *, repeats: int):
    o_ref[...] = _add_pe(x_ref[...], pe_ref[...], repeats).astype(o_ref.dtype)


def _posenc_kernel_train(seed_ref, x_ref, pe_ref, o_ref, *, repeats: int, p: float,
                         block_rows: int):
    y = _add_pe(x_ref[...], pe_ref[...], repeats)
    row_off = pl.program_id(0) * block_rows
    threshold = jnp.int32(min(int(round(p * (1 << 31))), (1 << 31) - 1))
    keep = _keep_mask(y.shape, row_off, seed_ref[0], threshold)
    inv_keep = jnp.asarray(1.0 / (1.0 - p), dtype=y.dtype)
    o_ref[...] = jnp.where(keep, y * inv_keep, jnp.zeros_like(y)).astype(o_ref.dtype)


# --------------------------------------------------------------------------------------
# Tiling helpers
# --------------------------------------------------------------------------------------
def _sublane_multiple(dtype) -> int:
    # 8 for 4-byte dtypes, 16 for bf16/fp16, 32 for int8/fp8 (sublane packing).
    return max(8, 32 // max(1, jnp.dtype(dtype).itemsize))


def _choose_block_s(S: int, row_bytes: int, sub: int) -> int:
    if S <= sub:
        return S
    rows = _TARGET_X_TILE_BYTES // max(row_bytes, 1)
    rows = max(sub, (rows // sub) * sub)
    # Keep at least 2 grid tiles so the "parallel" grid axis can shard the stream
    # across both TensorCores on v7x (harmless serial loop on v5e/v6e).
    two_tile_cap = max(sub, (pl.cdiv(S, 2) // sub) * sub)
    rows = min(rows, two_tile_cap)
    return min(rows, S)


# --------------------------------------------------------------------------------------
# Wrapper
# --------------------------------------------------------------------------------------
def positional_encoding(
    x: jnp.ndarray,
    pe: jnp.ndarray,
    *,
    dropout_p: float = 0.1,
    training: bool = False,
    seed: int = 0,
    block_s: int | None = None,
    donate_x: bool = False,
) -> jnp.ndarray:
    """x: [S, B, D]; pe: [max_len, 1, D] (as built by _make_pe).

    NOTE: in train mode, pass a fresh `seed` per training step / microbatch to avoid
    correlated dropout masks across steps (the mask is a pure function of seed+index).
    """
    S, B, D = x.shape
    max_len = pe.shape[0]
    assert S <= max_len, "sequence longer than positional-encoding buffer"

    dtype = x.dtype
    itemsize = jnp.dtype(dtype).itemsize
    sub = _sublane_multiple(dtype)

    # Compact pe in x's dtype (halves pe HBM bytes for bf16, keeps the add narrow).
    pe_s = pe.reshape(max_len, D)[:S].astype(dtype)

    row_bytes = B * D * itemsize
    if block_s is None:
        block_s = _choose_block_s(S, row_bytes, sub)
    else:
        # Validate user block_s against the (8,128) second-minor tiling rule.
        block_s = max(1, min(int(block_s), S))
        if block_s != S and block_s % sub != 0:
            block_s = min(S, max(sub, (block_s // sub) * sub))
    grid = (pl.cdiv(S, block_s),)

    use_3d = (D % 128 == 0) and (B % 8 == 0)
    if use_3d:
        # 3-D blocks: no lane-concat, pe broadcast along the sublane (batch) axis.
        x_in = x
        pe_in = pe_s.reshape(S, 1, D)
        x_block = (block_s, B, D)
        pe_block = (block_s, 1, D)
        repeats = 1
        out_struct = jax.ShapeDtypeStruct((S, B, D), dtype)
    else:
        # Lane-dense flattened view; pe stays compact and is replicated in-kernel.
        x_in = x.reshape(S, B * D)
        pe_in = pe_s
        repeats = B
        if D % 128 != 0:
            # Pre-tile pe to a 128-lane-aligned width so the in-kernel concat becomes
            # whole-vreg copies -- only when the extra pe HBM read stays negligible
            # (<= ~12.5% of the x read).
            r = None
            for cand in range(2, B + 1):
                if B % cand == 0 and (cand * D) % 128 == 0:
                    r = cand
                    break
            if r is not None and B // r >= 8:
                pe_in = jnp.tile(pe_s, (1, r))
                repeats = B // r
        x_block = (block_s, B * D)
        pe_block = (block_s, pe_in.shape[1])
        out_struct = jax.ShapeDtypeStruct((S, B * D), dtype)

    # VMEM budget: x tile + out tile + pe tile, 4x for double buffering + slack,
    # clamped to [16 MiB, 48 MiB] (safe on all of v5e/v6e/v7x).
    pe_row_elems = pe_in.size // S
    step_bytes = block_s * (2 * B * D + pe_row_elems) * itemsize
    vmem_limit = int(min(_VMEM_CAP_BYTES, max(16 << 20, 4 * step_bytes)))

    compiler_params = pltpu.CompilerParams(
        dimension_semantics=("parallel",),
        vmem_limit_bytes=vmem_limit,
    )

    nd = len(x_block)

    if (not training) or dropout_p == 0.0:
        if nd == 2:
            x_map = lambda i: (i, 0)
            pe_map = lambda i: (i, 0)
        else:
            x_map = lambda i: (i, 0, 0)
            pe_map = lambda i: (i, 0, 0)
        out = pl.pallas_call(
            functools.partial(_posenc_kernel_eval, repeats=repeats),
            out_shape=out_struct,
            grid_spec=pltpu.PrefetchScalarGridSpec(
                num_scalar_prefetch=0,
                grid=grid,
                in_specs=[
                    pl.BlockSpec(x_block, x_map),
                    pl.BlockSpec(pe_block, pe_map),
                ],
                out_specs=pl.BlockSpec(x_block, x_map),
            ),
            compiler_params=compiler_params,
            # Optional in-place reuse of x's buffer when the caller does not need x.
            input_output_aliases=({0: 0} if donate_x else {}),
        )(x_in, pe_in)
        return out.reshape(S, B, D)

    if dropout_p >= 1.0:
        return jnp.zeros_like(x)

    if nd == 2:
        x_map = lambda i, seed_ref: (i, 0)
        pe_map = lambda i, seed_ref: (i, 0)
    else:
        x_map = lambda i, seed_ref: (i, 0, 0)
        pe_map = lambda i, seed_ref: (i, 0, 0)

    seed_arr = jnp.asarray([seed], dtype=jnp.int32)
    out = pl.pallas_call(
        functools.partial(_posenc_kernel_train, repeats=repeats,
                          p=float(dropout_p), block_rows=block_s),
        out_shape=out_struct,
        grid_spec=pltpu.PrefetchScalarGridSpec(
            num_scalar_prefetch=1,          # seed lives in SMEM
            grid=grid,
            in_specs=[
                pl.BlockSpec(x_block, x_map),
                pl.BlockSpec(pe_block, pe_map),
            ],
            out_specs=pl.BlockSpec(x_block, x_map),
        ),
        compiler_params=compiler_params,
    )(seed_arr, x_in, pe_in)
    return out.reshape(S, B, D)


# --------------------------------------------------------------------------------------
# Demo / self-check
# --------------------------------------------------------------------------------------
if __name__ == "__main__":
    # Shapes consistent with the module's forward: [seq_len, batch, d_model].
    S, B, D = 16, 2, 64            # B*D = 128 -> lane-dense (unmasked) stores
    MAX_LEN = 128

    key = jax.random.PRNGKey(0)
    x = jax.random.normal(key, (S, B, D), dtype=jnp.float32)
    pe = _make_pe(D, MAX_LEN)

    # Eval-mode forward (dropout = identity), matching module.eval() semantics.
    out = jax.block_until_ready(
        positional_encoding(x, pe, dropout_p=0.1, training=False)
    )
    ref = x + pe[:S]
    assert out.shape == (S, B, D)
    assert jnp.allclose(out, ref, atol=1e-6, rtol=1e-6), "eval mismatch vs reference"

    # Non-lane-aligned shapes go through the flattened path (masked stores, correct).
    S2, B2, D2 = 8, 2, 32
    x_small = jax.random.normal(jax.random.PRNGKey(1), (S2, B2, D2), dtype=jnp.float32)
    pe_small = _make_pe(D2, 64)
    out_small = jax.block_until_ready(
        positional_encoding(x_small, pe_small, training=False)
    )
    assert jnp.allclose(out_small, x_small + pe_small[:S2], atol=1e-6, rtol=1e-6)

    # 3-D sublane-broadcast path (D % 128 == 0 and B % 8 == 0).
    S3, B3, D3 = 16, 8, 128
    x_big = jax.random.normal(jax.random.PRNGKey(2), (S3, B3, D3), dtype=jnp.float32)
    pe_big = _make_pe(D3, 32)
    out_big = jax.block_until_ready(
        positional_encoding(x_big, pe_big, training=False)
    )
    assert jnp.allclose(out_big, x_big + pe_big[:S3], atol=1e-6, rtol=1e-6)

    # Train-mode (in-kernel counter-hash dropout; semantics match inverted dropout,
    # bit pattern differs from torch's RNG).
    p = 0.1
    out_tr = jax.block_until_ready(
        positional_encoding(x, pe, dropout_p=p, training=True, seed=123)
    )
    assert out_tr.shape == (S, B, D)
    scaled = (x + pe[:S]) / (1.0 - p)
    ok = jnp.isclose(out_tr, scaled, atol=1e-5, rtol=1e-5) | (out_tr == 0.0)
    assert bool(jnp.all(ok)), "train-mode values are not {0, y/(1-p)}"
    drop_frac = float(jnp.mean((out_tr == 0.0).astype(jnp.float32)))
    assert 0.01 < drop_frac < 0.3, f"dropout fraction {drop_frac} implausible for p={p}"

    print("KERNEL_OK")
</pallas_src>

<mosaic_0001>
module attributes {stable_mosaic.version = 11 : i64} {
  func.func @_posenc_kernel_eval(%arg0: i32, %arg1: memref<8x128xf32, #tpu.memory_space<vmem>>, %arg2: memref<8x64xf32, #tpu.memory_space<vmem>>, %arg3: memref<8x128xf32, #tpu.memory_space<vmem>>) attributes {dimension_semantics = [#tpu.dimension_semantics<parallel>], iteration_bounds = array<i64: 2>, scalar_prefetch = 0 : i64, scratch_operands = 0 : i64, tpu.core_type = #tpu.core_type<tc>, window_params = [{transform_indices = @transform_0, window_bounds = array<i64: 8, 128>}, {transform_indices = @transform_1, window_bounds = array<i64: 8, 64>}, {transform_indices = @transform_2, window_bounds = array<i64: 8, 128>}]} {
    %c0 = arith.constant 0 : index
    %c0_0 = arith.constant 0 : index
    %0 = vector.load %arg1[%c0, %c0_0] : memref<8x128xf32, #tpu.memory_space<vmem>>, vector<8x128xf32>
    %c0_1 = arith.constant 0 : index
    %c0_2 = arith.constant 0 : index
    %1 = vector.load %arg2[%c0_1, %c0_2] : memref<8x64xf32, #tpu.memory_space<vmem>>, vector<8x64xf32>
    %2 = tpu.concatenate %1, %1 in 1 : vector<8x64xf32>, vector<8x64xf32> -> vector<8x128xf32>
    %3 = arith.addf %0, %2 : vector<8x128xf32>
    %c0_3 = arith.constant 0 : index
    %c0_4 = arith.constant 0 : index
    %4 = vector.load %arg3[%c0_3, %c0_4] : memref<8x128xf32, #tpu.memory_space<vmem>>, vector<8x128xf32>
    tpu.vector_store %arg3[%c0_3, %c0_4], %3 {strides = array<i32>} : memref<8x128xf32, #tpu.memory_space<vmem>>, vector<8x128xf32>,
    return
  }
  func.func @transform_0(%arg0: i32) -> (i32, i32) {
    %c0_i32 = arith.constant 0 : i32
    %c0_i32_0 = arith.constant 0 : i32
    return %arg0, %c0_i32 : i32, i32
  }
  func.func @transform_1(%arg0: i32) -> (i32, i32) {
    %c0_i32 = arith.constant 0 : i32
    %c0_i32_0 = arith.constant 0 : i32
    return %arg0, %c0_i32 : i32, i32
  }
  func.func @transform_2(%arg0: i32) -> (i32, i32) {
    %c0_i32 = arith.constant 0 : i32
    %c0_i32_0 = arith.constant 0 : i32
    return %arg0, %c0_i32 : i32, i32
  }
}

</mosaic_0001>

<bundles_post_ra>
// kernel: tpu_custom_call.1
= control target key start
LH: loop header
LB: loop body
LE: loop exit
PB: predicated region body
PF: predicated region fallthrough
CT: control target
= control target key end

     0   :  { %7 = vsyncpa [#allocation3], 0  ;;  %s719_s0 = inlined_call_operand.hbm [shape: f32[16,128], index: 0, kind: input, shape index: {}]   ;;  %s720_s1 = inlined_call_operand.hbm [shape: f32[16,64], index: 1, kind: input, shape index: {}]   ;;  %s721_s2 = inlined_call_operand.hbm [shape: f32[16,128], index: 2, kind: output, shape index: {}]  }
   0x1   :  { %9 = vsyncpa [#allocation3 + $0x1], 0 }
   0x2   :  { %10 = vsyncpa [#allocation6], 0 }
   0x3   :  { %12 = vsyncpa [#allocation6 + $0x1], 0 }
   0x4   :  { %13 = vsyncpa [#allocation4], 0 }
   0x5   :  { %15 = vsyncpa [#allocation4 + $0x1], 0  ;;  %s525_s9 = smov 0   ;;  %s527_s10 = smov 0  }
   0x6   :  { %s529_s11 = smov 0   ;;  %s531_s12 = smov 0  }
   0x7 LB: > { %s546_s13 = sadd.s32 4294967295, %s504_s12   ;;  %s313_s14 = sadd.s32 4294967294, %s504_s12   ;;  %s504_s12 = sphi %s531_s12, %s740_s12   ;;  %s500_s11 = sphi %s529_s11, %s739_s11   ;;  %s496_s10 = sphi %s527_s10, %s738_s10   ;;  %s492_s9 = sphi %s525_s9, %s737_s9  }
   0x8   : > { %s550_s15 = sadd.s32 1, %s504_s12   ;;  %s28_s16 = sadd.s32 1, %s500_s11 }
   0x9   : > { %s25_s17 = ssub.s32 %s504_s12, %s550_s15  ;;  %p35_p0 = scmp.ne.s32.totalorder %s500_s11, %s496_s10 }
   0xa   : > { %p26_p1 = scmp.eq.s32.totalorder %s25_s17, 0  ;;  %p36_p2 = scmp.eq.s32.totalorder %s504_s12, 0 }
   0xb   : > { %p41_p3 = scmp.ne.s32.totalorder %s496_s10, %s492_s9  ;;  %p42_p4 = scmp.eq.s32.totalorder %s546_s13, 0 }
   0xc   : > { %s562_s18 = scalar_select %p26_p1, %s500_s11, %s28_s16  }
   0xd   : > { %p564_p5 = por %p36_p2, %p35_p0  ;;  %p568_p6 = por %p42_p4, %p41_p3 }
   0xe   : > { %p91_p7 = scmp.eq.s32.totalorder %s546_s13, 1  ;;  %p97_p8 = scmp.eq.s32.totalorder %s313_s14, 1 }
   0xf   : > { %s725_s20 = scalar_select %p568_p6, 1, 0 }
  0x10   : > { %p345_p10 = scmp.lt.s32.totalorder %s504_s12, 2  ;;  %p575_p11 = por %p91_p7, %p35_p0 }
  0x11   : > { %p579_p12 = por %p97_p8, %p41_p3  ;;  %s584_s23 = sand.u32 1, %s500_s11  }
  0x12   : > { %s726_s21 = scalar_select %p575_p11, 1, 0 }
  0x13   : > { %s727_s22 = scalar_select %p579_p12, 1, 0 }
  0x14   : > { %s317_s24 = sshll.u32 %s504_s12, 7  ;;  %s316_s25 = sshll.u32 %s584_s23, 3 }
  0x15   : > { %s593_s28 = scalar_lea.hbm %s719_s0, %s317_s24  ;;  %s121_s29 = scalar_lea.vmem [#allocation2], %s316_s25 }
  0x16   : > { %s128_s30 = sshll.u32 %s121_s29, 4  ;;  %p599_p13 = pnand %p345_p10, %p564_p5  ;;  %s603_s30 = int_to_ptr.vmem [resolvable:$true] %s128_s30 }
  0x17   : > { %s118_s4 = scalar_lea.sflag [#allocation3], %s584_s23  ;;  %s380_s5 = scalar_lea.hbm %s593_s28, 128 }
  0x18   : > { %p381_p2 = scmp.ne.s32.totalorder %s593_s28, %s380_s5  ;;  %p382_p3 = pneg %p599_p13 }
  0x19   : > { %s385_s8 = scalar_lea.hbm %s719_s0, 256  ;;  %p386_p5 = scmp.lt.s32.totalorder %s593_s28, %s719_s0 }
  0x1a   : > { %p383_p4 = pnand %p382_p3, %p381_p2  ;;  %p387_p8 = scmp.lt.s32.totalorder %s385_s8, %s380_s5 }
  0x1c   : > { %p384_p7 = pneg %p383_p4  ;;  %p388_p10 = por %p387_p8, %p386_p5 }
  0x1e   : > { %p389_p9 = pnand %p388_p10, %p384_p7 }
  0x20   : > { %392 = shalt.err (!%p389_p9)
}
  0x21   : > { %s393_s17 = scalar_lea.vmem %s603_s30, 128  ;;  %s506_s19 = smov [#allocation2]  }
  0x22   : > { %p394_p0 = scmp.ne.s32.totalorder %s603_s30, %s393_s17  ;;  %s398_s26 = sshll.u32 %s506_s19, 4  ;;  %s399_s26 = int_to_ptr.vmem [resolvable:$false] %s398_s26 }
  0x23   : > { %s400_s27 = scalar_lea.vmem %s399_s26, 256  ;;  %p401_p1 = scmp.lt.s32.totalorder %s603_s30, %s399_s26 }
  0x24   : > { %p396_p2 = pnand %p394_p0, %p382_p3  ;;  %p402_p12 = scmp.lt.s32.totalorder %s400_s27, %s393_s17 }
  0x26   : > { %p397_p4 = pneg %p396_p2  ;;  %p403_p11 = por %p402_p12, %p401_p1 }
  0x28   : > { %p404_p5 = pnand %p403_p11, %p397_p4 }
  0x2a   : > { %407 = shalt.err (!%p404_p5)
}
  0x2b   : > { %337 = dma.hbm_to_vmem [thread:$0]  (!%p599_p13), %s593_s28, 128, %s603_s30, %s118_s4  }
  0x2c   : > { %p729_p9 = scmp.lt.s32.totalorder %s504_s12, 3  ;;  %p730_p0 = scmp.ge.s32.totalorder %s504_s12, 1 }
  0x2d   : > { %s645_s7 = scalar_lea.hbm %s720_s1, %s317_s24  ;;  %s139_s8 = scalar_lea.vmem [#allocation5], %s316_s25 }
  0x2e   : > { %p636_p7 = pnand %p730_p0, %p729_p9  ;;  %s146_s14 = sshll.u32 %s139_s8, 4  ;;  %s147_s14 = int_to_ptr.vmem [resolvable:$true] %s146_s14 }
  0x2f   : > { %s136_s28 = scalar_lea.sflag [#allocation6], %s584_s23  ;;  %s408_s30 = scalar_lea.hbm %s645_s7, 128 }
  0x30   : > { %s731_s29 = scalar_select %p636_p7, 1, 0 }
  0x31   : > { %p409_p11 = scmp.ne.s32.totalorder %s645_s7, %s408_s30  ;;  %s413_s17 = scalar_lea.hbm %s720_s1, 256 }
  0x32   : > { %p414_p8 = scmp.lt.s32.totalorder %s645_s7, %s720_s1  ;;  %p415_p10 = scmp.lt.s32.totalorder %s413_s17, %s408_s30 }
  0x33   : > { %p411_p12 = pnand %p409_p11, %p382_p3 }
  0x34   : > { %p416_p2 = por %p415_p10, %p414_p8 }
  0x35   : > { %p412_p1 = pneg %p411_p12 }
  0x37   : > { %p417_p4 = pnand %p416_p2, %p412_p1 }
  0x39   : > { %420 = shalt.err (!%p417_p4)
}
  0x3a   : > { %s421_s25 = scalar_lea.vmem %s147_s14, 128  ;;  %s507_s23 = smov [#allocation5]  }
  0x3b   : > { %p422_p5 = scmp.ne.s32.totalorder %s147_s14, %s421_s25  ;;  %s426_s26 = sshll.u32 %s507_s23, 4  ;;  %s427_s26 = int_to_ptr.vmem [resolvable:$false] %s426_s26 }
  0x3c   : > { %s428_s27 = scalar_lea.vmem %s427_s26, 256  ;;  %p429_p11 = scmp.lt.s32.totalorder %s147_s14, %s427_s26 }
  0x3d   : > { %p424_p9 = pnand %p422_p5, %p382_p3  ;;  %p430_p12 = scmp.lt.s32.totalorder %s428_s27, %s421_s25 }
  0x3f   : > { %p425_p0 = pneg %p424_p9  ;;  %p431_p6 = por %p430_p12, %p429_p11 }
  0x41   : > { %p432_p7 = pnand %p431_p6, %p425_p0 }
  0x43   : > { %435 = shalt.err (!%p432_p7)
}
  0x44   : > { %340 = dma.hbm_to_vmem [thread:$0]  (!%p599_p13), %s645_s7, 128, %s147_s14, %s136_s28  }
  0x45   : > { %p732_p1 = scmp.ne.s32.totalorder %s731_s29, 0 }
  0x46   : > { %s671_s5 = sand.u32 (!%p732_p1), 1, %s496_s10   ;;  %p733_p3 = scmp.ne.s32.totalorder (!%p732_p1), %s725_s20, 0 }
  0x47   : > { %155 = sbr.rel (%p732_p1) target bundleno = 211 (0xd3), region = 28  ;;  %s321_s6 = sshll.u32 (!%p732_p1), %s671_s5, 3 }
  0x48   : > { %s158_s8 = scalar_lea.sflag (!%p732_p1), [#allocation3], %s671_s5  ;;  %s161_s30 = scalar_lea.vmem (!%p732_p1), [#allocation2], %s321_s6 }
  0x4c   : > { %479 = dma.done.wait (%p733_p3), %s158_s8, 128  }
  0x4d   : > { %481 = vsyncadd (%p733_p3), %s158_s8, 4294967168  ;;  %s167_s3 = scalar_lea.sflag [#allocation6], %s671_s5  ;;  %s170_s7 = scalar_lea.vmem [#allocation5], %s321_s6 }
  0x4e   : > { %483 = dma.done.wait (%p733_p3), %s167_s3, 128  }
  0x4f   : > { %485 = vsyncadd (%p733_p3), %s167_s3, 4294967168  ;;  %v197_v0 = vld [vmem:[%s170_s7] sm:$0xff]  ;;  %s508_s29 = smov 64   ;;  %vm202_vm0 = vcmask 523264   ;;  %v196_v1 = vld [vmem:[%s161_s30] sm:$0xff]  ;;  %s325_s14 = sshll.u32 %s546_s13, 7 }
  0x50   : > { %199 = vrot.lane.b32.xlu0 %v197_v0, %s508_s29  ;;  %s195_s28 = scalar_lea.vmem [#allocation7], %s321_s6  ;;  %s218_s24 = scalar_lea.hbm %s721_s2, %s325_s14 }
  0x51   : > { %s220_s4 = sshll.u32 %s195_s28, 4  ;;  %s207_s20 = scalar_lea.sflag [#allocation4], %s671_s5  ;;  %s221_s4 = int_to_ptr.vmem [resolvable:$true] %s220_s4 }
  0x52   : > { %s436_s19 = scalar_lea.vmem %s221_s4, 128  ;;  %p734_p13 = scmp.ne.s32.totalorder %s726_s21, 0 }
  0x53   : > { %p437_p6 = scmp.ne.s32.totalorder %s221_s4, %s436_s19  ;;  %s509_s25 = smov [#allocation7]  }
  0x54   : > { %s440_s23 = sshll.u32 %s509_s25, 4  ;;  %s441_s23 = int_to_ptr.vmem [resolvable:$false] %s440_s23 }
  0x55   : > { %p438_p7 = pnand %p437_p6, %p734_p13  ;;  %s442_s13 = scalar_lea.vmem %s441_s23, 256 }
  0x56   : > { %p443_p10 = scmp.lt.s32.totalorder %s221_s4, %s441_s23  ;;  %p444_p2 = scmp.lt.s32.totalorder %s442_s13, %s436_s19 }
  0x57   : > { %p439_p8 = pneg %p438_p7 }
  0x58   : > { %p445_p4 = por %p444_p2, %p443_p10 }
  0x5a   : > { %p446_p5 = pnand %p445_p4, %p439_p8 }
  0xc2   : > { %v200_v2 = vpop.permute.xlu0 %199 }
  0xc3   : > { %v203_v3 = vsel %vm202_vm0, %v197_v0, %v200_v2 }
  0xc4   : > { %v204_v4 = vadd.f32 %v203_v3, %v196_v1 }
  0xc6   : > { %205 = vst [vmem:[%s195_s28] sm:$0xff] %v204_v4 }
  0xc7   : > { %449 = shalt.err (!%p446_p5)
}
  0xc8   : > { %s450_s26 = scalar_lea.hbm %s218_s24, 128  ;;  %s454_s6 = scalar_lea.hbm %s721_s2, 256 }
  0xc9   : > { %p451_p9 = scmp.ne.s32.totalorder %s218_s24, %s450_s26  ;;  %p455_p12 = scmp.lt.s32.totalorder %s218_s24, %s721_s2 }
  0xca   : > { %p456_p1 = scmp.lt.s32.totalorder %s454_s6, %s450_s26 }
  0xcb   : > { %p452_p0 = pnand %p451_p9, %p734_p13 }
  0xcc   : > { %p457_p3 = por %p456_p1, %p455_p12 }
  0xcd   : > { %p453_p11 = pneg %p452_p0 }
  0xcf   : > { %p458_p6 = pnand %p457_p3, %p453_p11 }
  0xd1   : > { %461 = shalt.err (!%p458_p6)
}
  0xd2   : > { %332 = dma.vmem_to_hbm [thread:$0]  (%p734_p13), %s221_s4, 128, %s218_s24, %s207_s20  }
  0xd3 PF: > { %s232_s3 = sand.u32 1, %s492_s9   ;;  %p735_p7 = scmp.ne.s32.totalorder %s727_s22, 0 }
  0xd4   : > { %p736_p8 = scmp.ge.s32.totalorder %s504_s12, 2  ;;  %s233_s7 = scalar_lea.sflag [#allocation4], %s232_s3 }
  0xd6   : > { %p342_p10 = pnand %p736_p8, %p735_p7 }
  0xd8   : > { %p343_p2 = pneg %p342_p10 }
  0xda   : > { %487 = dma.done.wait (%p343_p2), %s233_s7, 128  }
  0xdb   : > { %489 = vsyncadd (%p343_p2), %s233_s7, 4294967168  ;;  %p18_p4 = scmp.ge.s32.totalorder %s550_s15, 4   ;;  %s737_s9 = smov %s496_s10 }
  0xdc   : > { %s738_s10 = smov %s500_s11  ;;  %s739_s11 = smov %s562_s18 }
  0xdd   : > { %s740_s12 = smov %s550_s15  ;;  %20 = sbr.rel (!%p18_p4) target bundleno = 7 (0x7), region = 86 }
  0xe2   :  { %238 = vsyncpa [#allocation3], 1 }
  0xe3   :  { %240 = vsyncpa [#allocation3 + $0x1], 1 }
  0xe4   :  { %241 = vsyncpa [#allocation6], 1 }
  0xe5   :  { %243 = vsyncpa [#allocation6 + $0x1], 1 }
  0xe6   :  { %244 = vsyncpa [#allocation4], 1 }
  0xe7   :  { %246 = vsyncpa [#allocation4 + $0x1], 1 }

</bundles_post_ra>
